<compile_context>
chip_gen: v7x
topology: tpu7x:2x2x1
jax: 0.10.0
libtpu: 0.0.40
codegen_flags: <defaults>
</compile_context>

<pallas_src>
import jax
import jax.numpy as jnp
from jax import lax
from jax.experimental import pallas as pl
from jax.experimental.pallas import tpu as pltpu

# ---------------- SplAtConv2d hyper-parameters (small synthetic config) ------
IN_CH = 8          # in_channels
CH    = 8          # channels
KH = KW = 3        # kernel_size
STRIDE = (1, 1)
PAD    = (1, 1)
DIL    = (1, 1)
CARD   = 2         # groups / cardinality
RADIX  = 2
RED    = 4         # reduction_factor
INTER  = max(IN_CH * RADIX // RED, 32)   # = 32
COUT   = CH * RADIX                      # conv output channels
CPC    = CH // CARD                      # channels per cardinality group
EPS    = 1e-5


# ------------------------------- Pallas kernel -------------------------------
def make_splat_kernel(batch, psp):
    """Build the kernel for a given (batch, spatial-positions-per-image)."""
    inv_p = 1.0 / float(psp)

    def splat_kernel(patches_ref, wconv_ref, wfc1_ref, wfc2_ref, bias_ref, out_ref):
        # grouped conv as one block-diagonal matmul (bn0 + conv bias folded
        # into the weight/bias host-side) + relu.
        # (COUT, K) bf16 @ (K, B*P) bf16 -> (COUT, B*P) f32 accumulation.
        yT = jnp.dot(wconv_ref[...], patches_ref[...],
                     preferred_element_type=jnp.float32)
        yT = jnp.maximum(yT + bias_ref[0:COUT, :], 0.0)              # (COUT, BP)

        # radix-split sum + per-image global average pool -> (CH, B)
        ysum = yT[0:CH, :]
        for r in range(1, RADIX):
            ysum = ysum + yT[r * CH:(r + 1) * CH, :]
        gap_cols = [
            jnp.sum(ysum[:, b * psp:(b + 1) * psp], axis=1, keepdims=True) * inv_p
            for b in range(batch)
        ]
        gapT = gap_cols[0] if batch == 1 else jnp.concatenate(gap_cols, axis=1)

        # fc1 (grouped 1x1 conv, bn1 folded) + relu -> (INTER, B)
        hT = jnp.dot(wfc1_ref[...], gapT, preferred_element_type=jnp.float32)
        hT = jnp.maximum(hT + bias_ref[COUT:COUT + INTER, :], 0.0)

        # fc2 -> attention logits (COUT, B).  Rows were permuted host-side to
        # (radix, card, cpc) order so they line up with yT's channel layout.
        attT = jnp.dot(wfc2_ref[...], hT, preferred_element_type=jnp.float32)
        attT = attT + bias_ref[COUT + INTER:COUT + INTER + COUT, :]

        # rSoftMax over the radix axis, full CH-wide sublane blocks.
        if RADIX > 1:
            logits = [attT[r * CH:(r + 1) * CH, :] for r in range(RADIX)]
            m = logits[0]
            for r in range(1, RADIX):
                m = jnp.maximum(m, logits[r])
            exps = [jnp.exp(l - m) for l in logits]
            den = exps[0]
            for r in range(1, RADIX):
                den = den + exps[r]
            inv = pl.reciprocal(den, approx=True)
            weights = [e * inv for e in exps]                        # (CH, B) each
        else:
            weights = [1.0 / (1.0 + jnp.exp(-attT))]                 # sigmoid path

        # weighted sum of the radix splits; lane-dense (CH, P) store per image.
        for b in range(batch):
            acc = weights[0][:, b:b + 1] * yT[0:CH, b * psp:(b + 1) * psp]
            for r in range(1, RADIX):
                acc = acc + (weights[r][:, b:b + 1]
                             * yT[r * CH:(r + 1) * CH, b * psp:(b + 1) * psp])
            out_ref[b] = acc.astype(out_ref.dtype)

    return splat_kernel


# --------------------------------- glue (JAX) ---------------------------------
def _im2col_t(x, kh, kw, stride, padding, dilation):
    """im2col in transposed layout: (K, B*Ho*Wo), K is channel-major/kernel-minor."""
    B, C, H, W = x.shape
    sh, sw = stride
    ph, pw = padding
    dh, dw = dilation
    xp = jnp.pad(x, ((0, 0), (0, 0), (ph, ph), (pw, pw)))
    Hp, Wp = H + 2 * ph, W + 2 * pw
    Ho = (Hp - dh * (kh - 1) - 1) // sh + 1
    Wo = (Wp - dw * (kw - 1) - 1) // sw + 1
    cols = []
    for i in range(kh):
        for j in range(kw):
            sl = xp[:, :, i * dh: i * dh + sh * (Ho - 1) + 1: sh,
                          j * dw: j * dw + sw * (Wo - 1) + 1: sw]    # (B,C,Ho,Wo)
            cols.append(sl)
    pt = jnp.stack(cols, axis=2)                      # (B, C, kh*kw, Ho, Wo)
    pt = jnp.transpose(pt, (1, 2, 0, 3, 4))           # (C, kh*kw, B, Ho, Wo)
    pt = pt.reshape(C * kh * kw, B * Ho * Wo)         # (K, B*P)
    return pt, Ho, Wo


def _fold_bn(gamma, beta, mean, var):
    scale = gamma / jnp.sqrt(var + EPS)
    shift = beta - mean * scale
    return scale, shift


def splat_conv2d(x, p):
    B = x.shape[0]
    G = CARD * RADIX
    cin_pg = IN_CH // G
    cout_pg = COUT // G
    Kg = cin_pg * KH * KW
    K = IN_CH * KH * KW
    ipc = INTER // CARD
    opc = COUT // CARD

    bn0_s, bn0_b = _fold_bn(p["bn0_g"], p["bn0_b"], p["bn0_m"], p["bn0_v"])
    bn1_s, bn1_b = _fold_bn(p["bn1_g"], p["bn1_b"], p["bn1_m"], p["bn1_v"])

    # transposed block-diagonal grouped-conv weight (COUT, K), bn0 folded in
    wconvT = jnp.zeros((COUT, K), jnp.float32)
    for g in range(G):
        wg = p["conv_w"][g * cout_pg:(g + 1) * cout_pg].reshape(cout_pg, Kg)
        wconvT = wconvT.at[g * cout_pg:(g + 1) * cout_pg, g * Kg:(g + 1) * Kg].set(wg)
    wconvT = wconvT * bn0_s[:, None]
    bconv_f = p["conv_b"] * bn0_s + bn0_b                       # (COUT,)

    # transposed block-diagonal fc1 (INTER, CH), bn1 folded in
    wfc1T = jnp.zeros((INTER, CH), jnp.float32)
    for g in range(CARD):
        wg = p["fc1_w"][g * ipc:(g + 1) * ipc, :, 0, 0]         # (ipc, CPC)
        wfc1T = wfc1T.at[g * ipc:(g + 1) * ipc, g * CPC:(g + 1) * CPC].set(wg)
    wfc1T = wfc1T * bn1_s[:, None]
    bfc1_f = p["fc1_b"] * bn1_s + bn1_b                         # (INTER,)

    # transposed block-diagonal fc2 (COUT, INTER); rows permuted to
    # (radix, card, cpc) order so kernel-side softmax is full-width.
    wfc2T = jnp.zeros((COUT, INTER), jnp.float32)
    for g in range(CARD):
        wg = p["fc2_w"][g * opc:(g + 1) * opc, :, 0, 0]         # (opc, ipc)
        wfc2T = wfc2T.at[g * opc:(g + 1) * opc, g * ipc:(g + 1) * ipc].set(wg)
    perm = jnp.array([g * RADIX * CPC + r * CPC + c
                      for r in range(RADIX) for g in range(CARD) for c in range(CPC)],
                     dtype=jnp.int32)
    wfc2T = wfc2T[perm]
    bfc2_p = p["fc2_b"][perm]

    # pack all bias columns into one (COUT+INTER+COUT, 1) VMEM input
    biases = jnp.concatenate([bconv_f, bfc1_f, bfc2_p]).reshape(-1, 1).astype(jnp.float32)
    NB = COUT + INTER + COUT

    # TODO(synk): im2col is still materialized host-side; for real ResNeSt
    # shapes, do the conv as KH*KW shifted matmuls inside the kernel and add a
    # spatial tiling grid axis (re-derive tile size against v7x's 64 MiB VMEM).
    patchesT, Ho, Wo = _im2col_t(x, KH, KW, STRIDE, PAD, DIL)
    Psp = Ho * Wo
    BP = B * Psp

    kernel = make_splat_kernel(B, Psp)

    out = pl.pallas_call(
        kernel,
        out_shape=jax.ShapeDtypeStruct((B, CH, Psp), jnp.float32),
        grid_spec=pltpu.PrefetchScalarGridSpec(
            num_scalar_prefetch=0,
            grid=(1,),
            in_specs=[
                pl.BlockSpec((K, BP), lambda i: (0, 0)),          # im2col patches (bf16)
                pl.BlockSpec((COUT, K), lambda i: (0, 0)),        # conv weight (bf16)
                pl.BlockSpec((INTER, CH), lambda i: (0, 0)),      # fc1 weight (f32)
                pl.BlockSpec((COUT, INTER), lambda i: (0, 0)),    # fc2 weight (f32)
                pl.BlockSpec((NB, 1), lambda i: (0, 0)),          # packed biases (f32)
            ],
            out_specs=pl.BlockSpec((B, CH, Psp), lambda i: (0, 0, 0)),
        ),
        compiler_params=pltpu.CompilerParams(dimension_semantics=("arbitrary",)),
    )(patchesT.astype(jnp.bfloat16), wconvT.astype(jnp.bfloat16), wfc1T, wfc2T, biases)

    # output is already channel-major and lane-dense: just reshape to NCHW.
    return out.reshape(B, CH, Ho, Wo)


# -------------------------- pure-JAX reference (check) ------------------------
def reference(x, p):
    dn = ("NCHW", "OIHW", "NCHW")
    y = lax.conv_general_dilated(
        x, p["conv_w"], window_strides=STRIDE,
        padding=[(PAD[0], PAD[0]), (PAD[1], PAD[1])],
        rhs_dilation=DIL, feature_group_count=CARD * RADIX, dimension_numbers=dn)
    y = y + p["conv_b"][None, :, None, None]
    s0, b0 = _fold_bn(p["bn0_g"], p["bn0_b"], p["bn0_m"], p["bn0_v"])
    y = jnp.maximum(y * s0[None, :, None, None] + b0[None, :, None, None], 0.0)
    splits = [y[:, r * CH:(r + 1) * CH] for r in range(RADIX)]
    gap = sum(splits)
    gap = jnp.mean(gap, axis=(2, 3), keepdims=True)
    g1 = lax.conv_general_dilated(gap, p["fc1_w"], (1, 1), "VALID",
                                  feature_group_count=CARD, dimension_numbers=dn)
    g1 = g1 + p["fc1_b"][None, :, None, None]
    s1, b1 = _fold_bn(p["bn1_g"], p["bn1_b"], p["bn1_m"], p["bn1_v"])
    g1 = jnp.maximum(g1 * s1[None, :, None, None] + b1[None, :, None, None], 0.0)
    att = lax.conv_general_dilated(g1, p["fc2_w"], (1, 1), "VALID",
                                   feature_group_count=CARD, dimension_numbers=dn)
    att = (att + p["fc2_b"][None, :, None, None]).reshape(x.shape[0], -1)
    if RADIX > 1:
        a = att.reshape(-1, CARD, RADIX, COUT // (CARD * RADIX)).transpose(0, 2, 1, 3)
        a = jax.nn.softmax(a, axis=1).reshape(-1, COUT)
    else:
        a = jax.nn.sigmoid(att)
    a = a.reshape(-1, COUT, 1, 1)
    atts = [a[:, r * CH:(r + 1) * CH] for r in range(RADIX)]
    return sum(at * sp for at, sp in zip(atts, splits))


# ------------------------------------ main ------------------------------------
if __name__ == "__main__":
    key = jax.random.PRNGKey(0)
    keys = jax.random.split(key, 16)
    x = jax.random.normal(keys[0], (2, IN_CH, 16, 16), jnp.float32)

    cin_pg = IN_CH // (CARD * RADIX)
    params = dict(
        conv_w=0.2 * jax.random.normal(keys[1], (COUT, cin_pg, KH, KW), jnp.float32),
        conv_b=0.1 * jax.random.normal(keys[2], (COUT,), jnp.float32),
        bn0_g=1.0 + 0.1 * jax.random.normal(keys[3], (COUT,), jnp.float32),
        bn0_b=0.1 * jax.random.normal(keys[4], (COUT,), jnp.float32),
        bn0_m=0.1 * jax.random.normal(keys[5], (COUT,), jnp.float32),
        bn0_v=0.5 + jax.random.uniform(keys[6], (COUT,), jnp.float32),
        fc1_w=0.2 * jax.random.normal(keys[7], (INTER, CH // CARD, 1, 1), jnp.float32),
        fc1_b=0.1 * jax.random.normal(keys[8], (INTER,), jnp.float32),
        bn1_g=1.0 + 0.1 * jax.random.normal(keys[9], (INTER,), jnp.float32),
        bn1_b=0.1 * jax.random.normal(keys[10], (INTER,), jnp.float32),
        bn1_m=0.1 * jax.random.normal(keys[11], (INTER,), jnp.float32),
        bn1_v=0.5 + jax.random.uniform(keys[12], (INTER,), jnp.float32),
        fc2_w=0.2 * jax.random.normal(keys[13], (COUT, INTER // CARD, 1, 1), jnp.float32),
        fc2_b=0.1 * jax.random.normal(keys[14], (COUT,), jnp.float32),
    )

    out = jax.block_until_ready(splat_conv2d(x, params))
    ref = jax.block_until_ready(reference(x, params))
    assert out.shape == ref.shape, (out.shape, ref.shape)
    # tolerance accounts for bf16 conv operands (f32 MXU accumulation)
    err = float(jnp.max(jnp.abs(out - ref)))
    assert err < 5e-2, f"max abs err {err}"
    # TODO(synk): DropBlock2D (train-time stochastic regularizer) and BatchNorm
    # statistic updates are intentionally omitted (eval-mode / dropblock_prob=0).
    print("KERNEL_OK")
</pallas_src>

<mosaic_0001>
module attributes {stable_mosaic.version = 11 : i64} {
  func.func @splat_kernel(%arg0: i32, %arg1: memref<72x512xbf16, #tpu.memory_space<vmem>>, %arg2: memref<16x72xbf16, #tpu.memory_space<vmem>>, %arg3: memref<32x8xf32, #tpu.memory_space<vmem>>, %arg4: memref<16x32xf32, #tpu.memory_space<vmem>>, %arg5: memref<64x1xf32, #tpu.memory_space<vmem>>, %arg6: memref<2x8x256xf32, #tpu.memory_space<vmem>>) attributes {dimension_semantics = [#tpu.dimension_semantics<arbitrary>], iteration_bounds = array<i64: 1>, scalar_prefetch = 0 : i64, scratch_operands = 0 : i64, tpu.core_type = #tpu.core_type<tc>, window_params = [{pipeline_mode = #tpu.pipeline_mode<synchronous>, transform_indices = @transform_0, window_bounds = array<i64: 72, 512>}, {pipeline_mode = #tpu.pipeline_mode<synchronous>, transform_indices = @transform_1, window_bounds = array<i64: 16, 72>}, {pipeline_mode = #tpu.pipeline_mode<synchronous>, transform_indices = @transform_2, window_bounds = array<i64: 32, 8>}, {pipeline_mode = #tpu.pipeline_mode<synchronous>, transform_indices = @transform_3, window_bounds = array<i64: 16, 32>}, {pipeline_mode = #tpu.pipeline_mode<synchronous>, transform_indices = @transform_4, window_bounds = array<i64: 64, 1>}, {pipeline_mode = #tpu.pipeline_mode<synchronous>, transform_indices = @transform_5, window_bounds = array<i64: 2, 8, 256>}]} {
    %c0 = arith.constant 0 : index
    %c0_0 = arith.constant 0 : index
    %0 = vector.load %arg2[%c0, %c0_0] : memref<16x72xbf16, #tpu.memory_space<vmem>>, vector<16x72xbf16>
    %c0_1 = arith.constant 0 : index
    %c0_2 = arith.constant 0 : index
    %1 = vector.load %arg1[%c0_1, %c0_2] : memref<72x512xbf16, #tpu.memory_space<vmem>>, vector<72x512xbf16>
    %cst = arith.constant dense<0.000000e+00> : vector<16x512xf32>
    %2 = tpu.matmul %0, %1, %cst {dimension_numbers = #tpu.dot_dimension_numbers<[1], [0], [0], [1], [0, 0, 1, 1], [], []>} : vector<16x72xbf16>, vector<72x512xbf16>, vector<16x512xf32> -> vector<16x512xf32>
    %c0_3 = arith.constant 0 : index
    %c0_4 = arith.constant 0 : index
    %3 = vector.load %arg5[%c0_3, %c0_4] : memref<64x1xf32, #tpu.memory_space<vmem>>, vector<16x1xf32>
    %4 = vector.broadcast %3 : vector<16x1xf32> to vector<16x512xf32>
    %5 = arith.addf %2, %4 : vector<16x512xf32>
    %cst_5 = arith.constant 0.000000e+00 : f32
    %6 = vector.broadcast %cst_5 : f32 to vector<16x512xf32>
    %7 = arith.maximumf %5, %6 : vector<16x512xf32>
    %8 = vector.extract_strided_slice %7 {offsets = [0, 0], sizes = [8, 512], strides = [1, 1]} : vector<16x512xf32> to vector<8x512xf32>
    %9 = vector.extract_strided_slice %7 {offsets = [8, 0], sizes = [8, 512], strides = [1, 1]} : vector<16x512xf32> to vector<8x512xf32>
    %10 = arith.addf %8, %9 : vector<8x512xf32>
    %11 = vector.extract_strided_slice %10 {offsets = [0, 0], sizes = [8, 256], strides = [1, 1]} : vector<8x512xf32> to vector<8x256xf32>
    %cst_6 = arith.constant dense<0.000000e+00> : vector<8xf32>
    %12 = vector.multi_reduction <add>, %11, %cst_6 [1] : vector<8x256xf32> to vector<8xf32>
    %13 = vector.shape_cast %12 : vector<8xf32> to vector<8x1xf32>
    %cst_7 = arith.constant 3.906250e-03 : f32
    %14 = vector.broadcast %cst_7 : f32 to vector<8x1xf32>
    %15 = arith.mulf %13, %14 : vector<8x1xf32>
    %16 = vector.extract_strided_slice %10 {offsets = [0, 256], sizes = [8, 256], strides = [1, 1]} : vector<8x512xf32> to vector<8x256xf32>
    %cst_8 = arith.constant dense<0.000000e+00> : vector<8xf32>
    %17 = vector.multi_reduction <add>, %16, %cst_8 [1] : vector<8x256xf32> to vector<8xf32>
    %18 = vector.shape_cast %17 : vector<8xf32> to vector<8x1xf32>
    %cst_9 = arith.constant 3.906250e-03 : f32
    %19 = vector.broadcast %cst_9 : f32 to vector<8x1xf32>
    %20 = arith.mulf %18, %19 : vector<8x1xf32>
    %21 = tpu.concatenate %15, %20 in 1 : vector<8x1xf32>, vector<8x1xf32> -> vector<8x2xf32>
    %c0_10 = arith.constant 0 : index
    %c0_11 = arith.constant 0 : index
    %22 = vector.load %arg3[%c0_10, %c0_11] : memref<32x8xf32, #tpu.memory_space<vmem>>, vector<32x8xf32>
    %cst_12 = arith.constant dense<0.000000e+00> : vector<32x2xf32>
    %23 = tpu.matmul %22, %21, %cst_12 {dimension_numbers = #tpu.dot_dimension_numbers<[1], [0], [0], [1], [0, 0, 1, 1], [], []>} : vector<32x8xf32>, vector<8x2xf32>, vector<32x2xf32> -> vector<32x2xf32>
    %c16 = arith.constant 16 : index
    %c0_13 = arith.constant 0 : index
    %24 = vector.load %arg5[%c16, %c0_13] : memref<64x1xf32, #tpu.memory_space<vmem>>, vector<32x1xf32>
    %25 = vector.broadcast %24 : vector<32x1xf32> to vector<32x2xf32>
    %26 = arith.addf %23, %25 : vector<32x2xf32>
    %cst_14 = arith.constant 0.000000e+00 : f32
    %27 = vector.broadcast %cst_14 : f32 to vector<32x2xf32>
    %28 = arith.maximumf %26, %27 : vector<32x2xf32>
    %c0_15 = arith.constant 0 : index
    %c0_16 = arith.constant 0 : index
    %29 = vector.load %arg4[%c0_15, %c0_16] : memref<16x32xf32, #tpu.memory_space<vmem>>, vector<16x32xf32>
    %cst_17 = arith.constant dense<0.000000e+00> : vector<16x2xf32>
    %30 = tpu.matmul %29, %28, %cst_17 {dimension_numbers = #tpu.dot_dimension_numbers<[1], [0], [0], [1], [0, 0, 1, 1], [], []>} : vector<16x32xf32>, vector<32x2xf32>, vector<16x2xf32> -> vector<16x2xf32>
    %c48 = arith.constant 48 : index
    %c0_18 = arith.constant 0 : index
    %31 = vector.load %arg5[%c48, %c0_18] : memref<64x1xf32, #tpu.memory_space<vmem>>, vector<16x1xf32>
    %32 = vector.broadcast %31 : vector<16x1xf32> to vector<16x2xf32>
    %33 = arith.addf %30, %32 : vector<16x2xf32>
    %34 = vector.extract_strided_slice %33 {offsets = [0, 0], sizes = [8, 2], strides = [1, 1]} : vector<16x2xf32> to vector<8x2xf32>
    %35 = vector.extract_strided_slice %33 {offsets = [8, 0], sizes = [8, 2], strides = [1, 1]} : vector<16x2xf32> to vector<8x2xf32>
    %36 = arith.maximumf %34, %35 : vector<8x2xf32>
    %37 = arith.subf %34, %36 : vector<8x2xf32>
    %38 = math.exp %37 : vector<8x2xf32>
    %39 = arith.subf %35, %36 : vector<8x2xf32>
    %40 = math.exp %39 : vector<8x2xf32>
    %41 = arith.addf %38, %40 : vector<8x2xf32>
    %42 = tpu.reciprocal %41 {approx = true} : vector<8x2xf32> -> vector<8x2xf32>
    %43 = arith.mulf %38, %42 : vector<8x2xf32>
    %44 = arith.mulf %40, %42 : vector<8x2xf32>
    %45 = vector.extract_strided_slice %43 {offsets = [0, 0], sizes = [8, 1], strides = [1, 1]} : vector<8x2xf32> to vector<8x1xf32>
    %46 = vector.extract_strided_slice %7 {offsets = [0, 0], sizes = [8, 256], strides = [1, 1]} : vector<16x512xf32> to vector<8x256xf32>
    %47 = vector.broadcast %45 : vector<8x1xf32> to vector<8x256xf32>
    %48 = arith.mulf %47, %46 : vector<8x256xf32>
    %49 = vector.extract_strided_slice %44 {offsets = [0, 0], sizes = [8, 1], strides = [1, 1]} : vector<8x2xf32> to vector<8x1xf32>
    %50 = vector.extract_strided_slice %7 {offsets = [8, 0], sizes = [8, 256], strides = [1, 1]} : vector<16x512xf32> to vector<8x256xf32>
    %51 = vector.broadcast %49 : vector<8x1xf32> to vector<8x256xf32>
    %52 = arith.mulf %51, %50 : vector<8x256xf32>
    %53 = arith.addf %48, %52 : vector<8x256xf32>
    %c0_19 = arith.constant 0 : index
    %c0_20 = arith.constant 0 : index
    %c0_21 = arith.constant 0 : index
    %54 = vector.load %arg6[%c0_19, %c0_20, %c0_21] : memref<2x8x256xf32, #tpu.memory_space<vmem>>, vector<1x8x256xf32>
    %55 = vector.shape_cast %54 : vector<1x8x256xf32> to vector<8x256xf32>
    %56 = vector.shape_cast %53 : vector<8x256xf32> to vector<1x8x256xf32>
    tpu.vector_store %arg6[%c0_19, %c0_20, %c0_21], %56 {strides = array<i32>} : memref<2x8x256xf32, #tpu.memory_space<vmem>>, vector<1x8x256xf32>,
    %57 = vector.extract_strided_slice %43 {offsets = [0, 1], sizes = [8, 1], strides = [1, 1]} : vector<8x2xf32> to vector<8x1xf32>
    %58 = vector.extract_strided_slice %7 {offsets = [0, 256], sizes = [8, 256], strides = [1, 1]} : vector<16x512xf32> to vector<8x256xf32>
    %59 = vector.broadcast %57 : vector<8x1xf32> to vector<8x256xf32>
    %60 = arith.mulf %59, %58 : vector<8x256xf32>
    %61 = vector.extract_strided_slice %44 {offsets = [0, 1], sizes = [8, 1], strides = [1, 1]} : vector<8x2xf32> to vector<8x1xf32>
    %62 = vector.extract_strided_slice %7 {offsets = [8, 256], sizes = [8, 256], strides = [1, 1]} : vector<16x512xf32> to vector<8x256xf32>
    %63 = vector.broadcast %61 : vector<8x1xf32> to vector<8x256xf32>
    %64 = arith.mulf %63, %62 : vector<8x256xf32>
    %65 = arith.addf %60, %64 : vector<8x256xf32>
    %c1 = arith.constant 1 : index
    %c0_22 = arith.constant 0 : index
    %c0_23 = arith.constant 0 : index
    %66 = vector.load %arg6[%c1, %c0_22, %c0_23] : memref<2x8x256xf32, #tpu.memory_space<vmem>>, vector<1x8x256xf32>
    %67 = vector.shape_cast %66 : vector<1x8x256xf32> to vector<8x256xf32>
    %68 = vector.shape_cast %65 : vector<8x256xf32> to vector<1x8x256xf32>
    tpu.vector_store %arg6[%c1, %c0_22, %c0_23], %68 {strides = array<i32>} : memref<2x8x256xf32, #tpu.memory_space<vmem>>, vector<1x8x256xf32>,
    return
  }
  func.func @transform_0(%arg0: i32) -> (i32, i32) {
    %c0_i32 = arith.constant 0 : i32
    %c0_i32_0 = arith.constant 0 : i32
    %c0_i32_1 = arith.constant 0 : i32
    return %c0_i32, %c0_i32_0 : i32, i32
  }
  func.func @transform_1(%arg0: i32) -> (i32, i32) {
    %c0_i32 = arith.constant 0 : i32
    %c0_i32_0 = arith.constant 0 : i32
    %c0_i32_1 = arith.constant 0 : i32
    return %c0_i32, %c0_i32_0 : i32, i32
  }
  func.func @transform_2(%arg0: i32) -> (i32, i32) {
    %c0_i32 = arith.constant 0 : i32
    %c0_i32_0 = arith.constant 0 : i32
    %c0_i32_1 = arith.constant 0 : i32
    return %c0_i32, %c0_i32_0 : i32, i32
  }
  func.func @transform_3(%arg0: i32) -> (i32, i32) {
    %c0_i32 = arith.constant 0 : i32
    %c0_i32_0 = arith.constant 0 : i32
    %c0_i32_1 = arith.constant 0 : i32
    return %c0_i32, %c0_i32_0 : i32, i32
  }
  func.func @transform_4(%arg0: i32) -> (i32, i32) {
    %c0_i32 = arith.constant 0 : i32
    %c0_i32_0 = arith.constant 0 : i32
    %c0_i32_1 = arith.constant 0 : i32
    return %c0_i32, %c0_i32_0 : i32, i32
  }
  func.func @transform_5(%arg0: i32) -> (i32, i32, i32) {
    %c0_i32 = arith.constant 0 : i32
    %c0_i32_0 = arith.constant 0 : i32
    %c0_i32_1 = arith.constant 0 : i32
    %c0_i32_2 = arith.constant 0 : i32
    return %c0_i32, %c0_i32_0, %c0_i32_1 : i32, i32, i32
  }
}

</mosaic_0001>

<bundles_post_ra>
// kernel: tpu_custom_call.1
= control target key start
LH: loop header
LB: loop body
LE: loop exit
PB: predicated region body
PF: predicated region fallthrough
CT: control target
= control target key end

     0   :  { %10 = vsyncpa [#allocation3], 0  ;;  %s912_s0 = inlined_call_operand.hbm [shape: bf16[72,512], index: 0, kind: input, shape index: {}]   ;;  %s913_s1 = inlined_call_operand.vmem [shape: bf16[16,72], index: 1, kind: input, shape index: {}]   ;;  %s914_s2 = inlined_call_operand.vmem [shape: f32[32,8], index: 2, kind: input, shape index: {}]   ;;  %s915_s3 = inlined_call_operand.vmem [shape: f32[16,32], index: 3, kind: input, shape index: {}]   ;;  %s916_s4 = inlined_call_operand.vmem [shape: f32[64,1], index: 4, kind: input, shape index: {}]   ;;  %s917_s5 = inlined_call_operand.hbm [shape: f32[2,8,256], index: 5, kind: output, shape index: {}]  }
   0x1   :  { %11 = vsyncpa [#allocation4], 0  ;;  %s739_s18 = smov [#allocation2]   ;;  %s691_s22 = scalar_lea.hbm %s912_s0, 2304 }
   0x2   :  { %s17_s19 = sshll.u32 %s739_s18, 4  ;;  %p692_p0 = scmp.ne.s32.totalorder %s912_s0, %s691_s22  ;;  %s18_s19 = int_to_ptr.vmem [resolvable:$true] %s17_s19 }
   0x3   :  { %p695_p1 = scmp.lt.u32.totalorder %s691_s22, %s912_s0 }
   0x5   :  { %p697_p2 = pnand %p695_p1, %p692_p0 }
   0x7   :  { %700 = shalt.err (!%p697_p2)
}
   0x8   :  { %s701_s27 = scalar_lea.vmem %s18_s19, 2304  ;;  %p706_p4 = scmp.lt.s32.totalorder %s18_s19, %s18_s19 }
   0x9   :  { %p702_p3 = scmp.ne.s32.totalorder %s18_s19, %s701_s27  ;;  %p707_p5 = scmp.lt.s32.totalorder %s701_s27, %s701_s27 }
   0xb   :  { %p708_p6 = por %p707_p5, %p706_p4 }
   0xd   :  { %p709_p7 = pnand %p708_p6, %p702_p3 }
   0xf   :  { %712 = shalt.err (!%p709_p7)
}
  0x10   :  { %s740_s28 = smov 256   ;;  %s741_s29 = smov 16  }
  0x11   :  { %23 = dma.hbm_to_vmem [thread:$0]  %s912_s0, 2304, %s18_s19, [#allocation3], %s740_s28, %s740_s28, %s741_s29  }
  0x12   :  { %735 = dma.done.wait [#allocation3], 2304  }
  0x13   :  { %736 = vsyncadd [#allocation3], 4294964992  ;;  %v742_v0 = vmov 0   ;;  %v656_v1 = vld [vmem:[#allocation2 + $0x4] ss:$16 sps:$4 sm:$0xff]   ;;  %v55_v16 = vld [vmem:[#allocation2 + $0x88] sm:$0xff] }
  0x14   :  { %212 = vmatprep.mubr.bf16.mxu0 %v742_v0  ;;  %255 = vmatprep.mubr.bf16.mxu1 %v742_v0  ;;  %v658_v2 = vld [vmem:[#allocation2 + $0xc] ss:$16 sps:$4 sm:$0xff]   ;;  %v660_v3 = vld [vmem:[#allocation2] ss:$16 sps:$4 sm:$0xff]   ;;  %v661_v4 = vld [vmem:[#allocation2 + $0x8] ss:$16 sps:$4 sm:$0xff]   ;;  %v597_v21 = vcombine.high %v55_v16, %v55_v16  ;;  %v596_v23 = vcombine.low %v55_v16, %v55_v16 }
  0x15   :  { %652 = vset.pattern.permute.xlu0 %v742_v0  ;;  %653 = vset.pattern.permute.xlu1 %v742_v0  ;;  %v662_v5 = vld [vmem:[#allocation2 + $0x24] ss:$16 sps:$4 sm:$0xff]   ;;  %v664_v6 = vld [vmem:[#allocation2 + $0x2c] ss:$16 sps:$4 sm:$0xff]   ;;  %v666_v7 = vld [vmem:[#allocation2 + $0x20] ss:$16 sps:$4 sm:$0xff]  }
  0x16   :  { %180 = vmatprep.subr.bf16.mxu0 %v656_v1  ;;  %223 = vmatprep.subr.bf16.mxu1 %v658_v2  ;;  %v667_v8 = vld [vmem:[#allocation2 + $0x28] ss:$16 sps:$4 sm:$0xff]   ;;  %v668_v9 = vld [vmem:[#allocation2 + $0x44] ss:$16 sps:$4 sm:$0xff]   ;;  %v670_v10 = vld [vmem:[#allocation2 + $0x4c] ss:$16 sps:$4 sm:$0xff]  }
  0x17   :  { %181 = vmatpush1.bf16.msra.mxu0 %v660_v3  ;;  %224 = vmatpush1.bf16.msra.mxu1 %v661_v4  ;;  %v672_v11 = vld [vmem:[#allocation2 + $0x40] ss:$16 sps:$4 sm:$0xff]   ;;  %v673_v12 = vld [vmem:[#allocation2 + $0x48] ss:$16 sps:$4 sm:$0xff]   ;;  %v674_v13 = vld [vmem:[#allocation2 + $0x64] ss:$16 sps:$4 sm:$0xff]  }
  0x18   :  { %182 = vmatprep.subr.bf16.mxu0 %v662_v5  ;;  %225 = vmatprep.subr.bf16.mxu1 %v664_v6  ;;  %v676_v14 = vld [vmem:[#allocation2 + $0x6c] ss:$16 sps:$4 sm:$0xff]   ;;  %v54_v15 = vld [vmem:[#allocation2 + $0x80] sm:$0xff]  ;;  %v679_v18 = vld [vmem:[#allocation2 + $0x68] ss:$16 sps:$4 sm:$0xff]   ;;  %vm167_vm0 = vcmask 1043456  }
  0x19   :  { %v678_v17 = vld [vmem:[#allocation2 + $0x60] ss:$16 sps:$4 sm:$0xff]   ;;  %v595_v19 = vcombine.high %v54_v15, %v54_v15  ;;  %v594_v22 = vcombine.low %v54_v15, %v54_v15  ;;  %v57_v24 = vld [vmem:[%s916_s4 + $0x8] sm:$0xff]  ;;  %v175_v26 = vsel %vm167_vm0, %v596_v23, 0  ;;  %vm163_vm1 = vcmask 588800   ;;  %v421_v32 = vld [vmem:[%s916_s4 + $0x38] sm:$0xff] }
  0x1a   :  { %v56_v20 = vld [vmem:[%s916_s4] sm:$0xff]  ;;  %v292_v28 = vld [vmem:[%s916_s4 + $0x10] sm:$0xff]  ;;  %v295_v30 = vld [vmem:[%s916_s4 + $0x28] sm:$0xff]  ;;  %vm316_vm2 = vcmask 64512   ;;  %vm286_vm3 = vcmask 7168   ;;  %vm432_vm4 = vcmask 261120  }
  0x1b   :  { %183 = vmatpush1.bf16.msra.mxu0 %v666_v7  ;;  %226 = vmatpush1.bf16.msra.mxu1 %v667_v8  ;;  %v169_v25 = vsel %vm167_vm0, %v594_v22, 0  ;;  %v684_v27 = vld [vmem:[%s913_s1] sm:$0xff]   ;;  %v420_v31 = vld [vmem:[%s916_s4 + $0x30] sm:$0xff]  ;;  %v293_v2 = vld [vmem:[%s916_s4 + $0x18] sm:$0xff] }
  0x1c   :  { %184 = vmatprep.subr.bf16.mxu0 %v668_v9  ;;  %227 = vmatprep.subr.bf16.mxu1 %v670_v10  ;;  %v294_v29 = vld [vmem:[%s916_s4 + $0x20] sm:$0xff]  ;;  %v289_v8 = vld [vmem:[%s914_s2 + $0x8] sm:$0xff]  ;;  %v290_v9 = vld [vmem:[%s914_s2 + $0x10] sm:$0xff] }
  0x1d   :  { %60 = vperm.xlu0 %652, %v56_v20   ;;  %v288_v1 = vld [vmem:[%s914_s2] sm:$0xff]  ;;  %v291_v10 = vld [vmem:[%s914_s2 + $0x18] sm:$0xff] }
  0x1f   :  { %185 = vmatpush1.bf16.msra.mxu0 %v672_v11  ;;  %228 = vmatpush1.bf16.msra.mxu1 %v673_v12  ;;  %v418_v11 = vld [vmem:[%s915_s3] sm:$0xff] }
  0x20   :  { %186 = vmatprep.subr.bf16.mxu0 %v674_v13  ;;  %229 = vmatprep.subr.bf16.mxu1 %v676_v14 }
  0x21   :  { %65 = vperm.xlu0 %652, %v57_v24  }
  0x23   :  { %187 = vmatpush1.bf16.msra.mxu0 %v678_v17  ;;  %230 = vmatpush1.bf16.msra.mxu1 %v679_v18 }
  0x24   :  { %598 = vmatprep.subr.msk.bf16.mxu0 %vm167_vm0, %v595_v19  ;;  %600 = vmatprep.subr.msk.bf16.mxu1 %vm167_vm0, %v597_v21 }
  0x25   :  { %298 = vperm.xlu0 %652, %v292_v28  }
  0x27   :  { %189 = vmatpush1.bf16.msra.mxu0 %v169_v25  ;;  %232 = vmatpush1.bf16.msra.mxu1 %v175_v26 }
  0x29   :  { %308 = vperm.xlu0 %652, %v294_v29  }
  0x2a   :  { %599 = vmatmul.mubr.msk.bf16.vlgmr.msra.gmra.mrb[0].mxu0 %vm163_vm1, %v684_v27  ;;  %601 = vmatmul.mubr.msk.bf16.vlgmr.msra.gmra.mrb[0].mxu1 %vm163_vm1, %v684_v27 }
  0x2b   :  { %621 = vmatprep.mubr.msk.f32.mxu0 %vm316_vm2, %v288_v1  ;;  %635 = vmatprep.mubr.msk.f32.mxu1 %vm432_vm4, %v418_v11 }
  0x2d   :  { %313 = vperm.xlu0 %652, %v295_v30   ;;  %v419_v30 = vld [vmem:[%s915_s3 + $0x8] sm:$0xff]  ;;  %s744_s3 = smov [#allocation5]  }
  0x2e   :  { %s565_s9 = sshll.u32 %s744_s3, 4  ;;  %s566_s9 = int_to_ptr.vmem [resolvable:$true] %s565_s9 }
  0x2f   :  { %s713_s10 = scalar_lea.vmem %s566_s9, 512  ;;  %p718_p9 = scmp.lt.s32.totalorder %s566_s9, %s566_s9 }
  0x30   :  { %p714_p8 = scmp.ne.s32.totalorder %s566_s9, %s713_s10  ;;  %p719_p10 = scmp.lt.s32.totalorder %s713_s10, %s713_s10 }
  0x31   :  { %424 = vperm.xlu0 %652, %v420_v31  }
  0x32   :  { %p720_p11 = por %p719_p10, %p718_p9 }
  0x34   :  { %p721_p12 = pnand %p720_p11, %p714_p8 }
  0x35   :  { %429 = vperm.xlu0 %652, %v421_v32  }
  0x9c   :  { %v61_v33 = vpop.permute.xlu0 %60 }
  0xa0   :  { %v66_v34 = vpop.permute.xlu0 %65 }
  0xa4   :  { %v299_v12 = vpop.permute.xlu0 %298 }
  0xa8   :  { %v309_v13 = vpop.permute.xlu0 %308 }
  0xac   :  { %v314_v20 = vpop.permute.xlu0 %313 }
  0xb0   :  { %v425_v31 = vpop.permute.xlu0 %424 }
  0xb4   :  { %v430_v32 = vpop.permute.xlu0 %429 }
  0xfd   :  { %v214_v35 = vpop.f32.mrb[0].mxu0  ;;  %v257_v36 = vpop.f32.mrb[0].mxu1 }
  0xfe   :  { %v814_v37 = vadd.f32 %v214_v35, %v61_v33  ;;  %v216_v38 = vpop.f32.mrb[1].mxu0  ;;  %v259_v39 = vpop.f32.mrb[1].mxu1  ;;  %v822_v47 = vadd.f32 %v257_v36, %v61_v33 }
  0xff   :  { %v816_v40 = vadd.f32 %v216_v38, %v61_v33  ;;  %v218_v41 = vpop.f32.mrb[2].mxu0  ;;  %v261_v42 = vpop.f32.mrb[2].mxu1  ;;  %v824_v48 = vadd.f32 %v259_v39, %v61_v33 }
 0x100   :  { %v818_v43 = vadd.f32 %v218_v41, %v66_v34  ;;  %v820_v44 = vadd.f32 %v261_v42, %v66_v34  ;;  %v220_v45 = vpop.f32.mrb[3].mxu0  ;;  %v263_v46 = vpop.f32.mrb[3].mxu1  ;;  %v266_v51 = vmax.f32 %v814_v37, 0.0  ;;  %v268_v58 = vmax.f32 %v822_v47, 0.0 }
 0x101   :  { %v826_v49 = vadd.f32 %v220_v45, %v66_v34  ;;  %v828_v50 = vadd.f32 %v263_v46, %v66_v34  ;;  %v267_v53 = vmax.f32 %v816_v40, 0.0  ;;  %v269_v59 = vmax.f32 %v824_v48, 0.0 }
 0x102   :  { %v270_v52 = vmax.f32 %v818_v43, 0.0  ;;  %v272_v54 = vmax.f32 %v820_v44, 0.0 }
 0x103   :  { %v271_v55 = vmax.f32 %v826_v49, 0.0  ;;  %v273_v56 = vmax.f32 %v828_v50, 0.0 }
 0x104   :  { %v274_v57 = vadd.f32 %v270_v52, %v266_v51  ;;  %v276_v61 = vadd.f32 %v272_v54, %v268_v58 }
 0x105   :  { %v275_v60 = vadd.f32 %v271_v55, %v267_v53  ;;  %v277_v62 = vadd.f32 %v273_v56, %v269_v59 }
 0x107   :  { %v278_v63 = vadd.f32 %v275_v60, %v274_v57  ;;  %v282_v0 = vadd.f32 %v277_v62, %v276_v61 }
 0x109   :  { %279 = vadd.xlane.f32.xlu1 %v278_v63 }
 0x10d   :  { %283 = vadd.xlane.f32.xlu1 %v282_v0  ;;  %v743_v0 = vmov 1  }
 0x11e   :  { %303 = vperm.xlu1 %653, %v293_v2  }
 0x196   :  { %v280_v3 = vpop.xlane.xlu1 %279 }
 0x197   :  { %v281_v5 = vmul.f32 0.00390625, %v280_v3 }
 0x19a   :  { %v284_v4 = vpop.xlane.xlu1 %283 }
 0x19b   :  { %v285_v6 = vmul.f32 0.00390625, %v284_v4 }
 0x19d   :  { %v287_v7 = vsel %vm286_vm3, %v281_v5, %v285_v6 }
 0x19e   :  { %619 = vmatprep.subr.mxu0 %v287_v7  ;;  %v304_v14 = vpop.permute.xlu1 %303 }
 0x19f   :  { %620 = vmatpush3.msra.mxu0 %v287_v7 }
 0x1a0   :  { %622 = vmatmul.mubr.msk.f32.vlgmr.msra.gmra.mrb[4].mxu0 %vm316_vm2, %v289_v8 }
 0x1a1   :  { %624 = vmatprep.mubr.msk.f32.mxu0 %vm316_vm2, %v290_v9 }
 0x1a4   :  { %625 = vmatmul.mubr.msk.f32.gmra.mrb[6].mxu0 %vm316_vm2, %v291_v10 }
 0x273   :  { %v623_v15 = vpop.f32.mrb[4].mxu0 }
 0x274   :  { %v395_v16 = vpop.f32.mrb[5].mxu0  ;;  %v401_v17 = vadd.f32 %v623_v15, %v304_v14 }
 0x275   :  { %v396_v18 = vadd.f32 %v395_v16, %v299_v12 }
 0x276   :  { %v415_v19 = vmax.f32 %v401_v17, 0.0 }
 0x277   :  { %v414_v21 = vmax.f32 %v396_v18, 0.0  ;;  %v626_v22 = vpop.f32.mrb[6].mxu0 }
 0x278   :  { %v411_v23 = vadd.f32 %v626_v22, %v314_v20  ;;  %v405_v24 = vpop.f32.mrb[7].mxu0 }
 0x279   :  { %v638_v25 = vpack.c.bf16 %v415_v19, %v414_v21  ;;  %v406_v26 = vadd.f32 %v405_v24, %v309_v13 }
 0x27a   :  { %v417_v27 = vmax.f32 %v411_v23, 0.0 }
 0x27b   :  { %v416_v28 = vmax.f32 %v406_v26, 0.0  ;;  %639 = vmatprep.subr.bf16.mxu1 %v638_v25 }
 0x27c   :  { %641 = vmatpush3.bf16.msra.mxu1 %v638_v25 }
 0x27d   :  { %v642_v29 = vpack.c.bf16 %v417_v27, %v416_v28 }
 0x27f   :  { %643 = vmatprep.subr.bf16.mxu1 %v642_v29 }
 0x280   :  { %645 = vmatpush3.bf16.msra.mxu1 %v642_v29 }
 0x283   :  { %636 = vmatmul.mubr.msk.f32.vlgmr.msra.gmra.mrb[4].mxu1 %vm432_vm4, %v419_v30 }
 0x356   :  { %v637_v33 = vpop.f32.mrb[4].mxu1 }
 0x357   :  { %v511_v34 = vadd.f32 %v637_v33, %v430_v32  ;;  %v505_v35 = vpop.f32.mrb[5].mxu1 }
 0x358   :  { %v506_v36 = vadd.f32 %v505_v35, %v425_v31 }
 0x35a   :  { %v514_v38 = vmax.f32 %v506_v36, %v511_v34 }
 0x35c   :  { %v515_v39 = vsub.f32 %v506_v36, %v514_v38  ;;  %v518_v41 = vsub.f32 %v511_v34, %v514_v38 }
 0x35e   :  { %v516_v42 = vmul.f32 1.442695, %v515_v39  ;;  %v519_v45 = vmul.f32 1.442695, %v518_v41 }
 0x360   :  { %685 = vpow2.f32 %v516_v42 }
 0x361   :  { %687 = vpow2.f32 %v519_v45 }
 0x36a   :  { %v686_v46 = vpop.eup %685 }
 0x36b   :  { %v688_v57 = vpop.eup %687 }
 0x36c   :  { %v521_v60 = vadd.f32 %v688_v57, %v686_v46 }
 0x36e   :  { %689 = vrcp.f32 %v521_v60 }
 0x378   :  { %v690_v61 = vpop.eup %689 }
 0x379   :  { %v524_v62 = vmul.f32 %v690_v61, %v688_v57  ;;  %v523_v63 = vmul.f32 %v690_v61, %v686_v46 }
 0x37b   :  { %534 = vperm.xlu0 %652, %v524_v62   ;;  %527 = vperm.xlu1 %653, %v523_v63  }
 0x37f   :  { %655 = vset.pattern.permute.xlu0 %v743_v0  ;;  %654 = vset.pattern.permute.xlu1 %v743_v0 }
 0x380   :  { %550 = vperm.xlu0 %655, %v524_v62   ;;  %544 = vperm.xlu1 %654, %v523_v63  }
 0x3fa   :  { %v535_v1 = vpop.permute.xlu0 %534  ;;  %v528_v2 = vpop.permute.xlu1 %527 }
 0x3fb   :  { %v537_v3 = vmul.f32 %v535_v1, %v270_v52  ;;  %v538_v4 = vmul.f32 %v535_v1, %v271_v55  ;;  %v530_v5 = vmul.f32 %v528_v2, %v266_v51  ;;  %v531_v6 = vmul.f32 %v528_v2, %v267_v53 }
 0x3fd   :  { %v539_v7 = vadd.f32 %v537_v3, %v530_v5  ;;  %v540_v8 = vadd.f32 %v538_v4, %v531_v6 }
 0x3ff   :  { %541 = vst [vmem:[#allocation5] sm:$0xff] %v539_v7  ;;  %542 = vst [vmem:[#allocation5 + $0x8] sm:$0xff] %v540_v8  ;;  %v551_v9 = vpop.permute.xlu0 %550  ;;  %v545_v10 = vpop.permute.xlu1 %544 }
 0x400   :  { %v553_v43 = vmul.f32 %v551_v9, %v272_v54  ;;  %v554_v49 = vmul.f32 %v551_v9, %v273_v56  ;;  %v547_v37 = vmul.f32 %v545_v10, %v268_v58  ;;  %v548_v40 = vmul.f32 %v545_v10, %v269_v59 }
 0x402   :  { %v555_v51 = vadd.f32 %v553_v43, %v547_v37  ;;  %v556_v52 = vadd.f32 %v554_v49, %v548_v40 }
 0x404   :  { %558 = vst [vmem:[#allocation5 + $0x10] sm:$0xff] %v555_v51  ;;  %559 = vst [vmem:[#allocation5 + $0x18] sm:$0xff] %v556_v52 }
 0x405   :  { %724 = shalt.err (!%p721_p12)
}
 0x406   :  { %s725_s13 = scalar_lea.hbm %s917_s5, 512 }
 0x407   :  { %p726_p13 = scmp.ne.s32.totalorder %s917_s5, %s725_s13  ;;  %p729_p0 = scmp.lt.u32.totalorder %s725_s13, %s917_s5 }
 0x409   :  { %p731_p1 = pnand %p729_p0, %p726_p13 }
 0x40b   :  { %734 = shalt.err (!%p731_p1)
}
 0x40c   :  { %571 = dma.vmem_to_hbm [thread:$0]  %s566_s9, 512, %s917_s5, [#allocation4], %s740_s28, %s740_s28, %s741_s29  }
 0x40d   :  { %737 = dma.done.wait [#allocation4], 512  }
 0x40e   :  { %738 = vsyncadd [#allocation4], 4294966784 }
 0x40f   :  { %575 = vsyncpa [#allocation3], 1 }
 0x410   :  { %576 = vsyncpa [#allocation4], 1 }

</bundles_post_ra>
